<compile_context>
chip_gen: v7x
topology: tpu7x:2x2x1
jax: 0.10.0
libtpu: 0.0.40
codegen_flags: <defaults>
</compile_context>

<pallas_src>
import jax
import jax.numpy as jnp
from jax.experimental import pallas as pl
from jax.experimental.pallas import tpu as pltpu


def _round_up(x, m):
    return ((x + m - 1) // m) * m


def _cdiv(a, b):
    return (a + b - 1) // b


def _kws_kernel(x_ref, w1_ref, b1_ref, w2_ref, b2_ref, w3_ref, b3_ref, o_ref):
    # global_cmvn is folded into (w1, b1) at parameter-prep time.
    # In-kernel cast (no-op for f32 operands; free when using a bf16 weight path).
    x = x_ref[...].astype(w1_ref.dtype)

    # preprocessing: Linear(idim -> hpad) + ReLU   (f32 accumulation on MXU)
    h = jnp.dot(x, w1_ref[...], preferred_element_type=jnp.float32) + b1_ref[...]
    h = jnp.maximum(h, 0.0)

    # backbone: Linear(hpad -> hpad) + ReLU   (stateless: out_cache = in_cache)
    h = jnp.dot(h.astype(w2_ref.dtype), w2_ref[...],
                preferred_element_type=jnp.float32) + b2_ref[...]
    h = jnp.maximum(h, 0.0)

    # classifier: Linear(hpad -> odim), compact (un-padded) output lanes
    logits = jnp.dot(h.astype(w3_ref.dtype), w3_ref[...],
                     preferred_element_type=jnp.float32) + b3_ref[...]

    # activation: Sigmoid, applied on the compact (tm, odim) tile
    o_ref[...] = jax.nn.sigmoid(logits)


def prepare_params(raw_params, *, lane=128, operand_dtype=jnp.float32):
    """Fold cmvn into layer 1 and zero-pad the *hidden* dim to a lane multiple.

    raw_params = (mean, istd, w_pre, b_pre, w_bb, b_bb, w_cls, b_cls)
    Returns (w1, b1, w2, b2, w3, b3).  The output dim stays compact (odim).
    """
    mean, istd, w_pre, b_pre, w_bb, b_bb, w_cls, b_cls = raw_params
    idim, hdim = w_pre.shape
    odim = w_cls.shape[1]

    mean = mean.reshape(1, idim).astype(jnp.float32)
    istd = istd.reshape(1, idim).astype(jnp.float32)

    # Fold cmvn: ((x - mean)*istd) @ W + b == x @ (diag(istd) @ W) + (b - (mean*istd) @ W)
    w1 = istd.reshape(idim, 1) * w_pre.astype(jnp.float32)
    b1 = b_pre.reshape(1, hdim).astype(jnp.float32) \
        - (mean * istd) @ w_pre.astype(jnp.float32)

    hpad = _round_up(hdim, lane)

    def pad2(a, r, c):
        return jnp.pad(a, ((0, r - a.shape[0]), (0, c - a.shape[1])))

    w1 = pad2(w1, idim, hpad)
    b1 = pad2(b1, 1, hpad)
    w2 = pad2(w_bb.astype(jnp.float32), hpad, hpad)
    b2 = pad2(b_bb.reshape(1, hdim).astype(jnp.float32), 1, hpad)
    w3 = pad2(w_cls.astype(jnp.float32), hpad, odim)     # rows padded, lanes compact
    b3 = b_cls.reshape(1, odim).astype(jnp.float32)

    # MXU operands may be bf16 (biases stay f32; f32 accumulation in-kernel).
    w1 = w1.astype(operand_dtype)
    w2 = w2.astype(operand_dtype)
    w3 = w3.astype(operand_dtype)
    return (w1, b1, w2, b2, w3, b3)


def _vmem_budget():
    """Per-generation (soft VMEM cap for this kernel, row-tile cap)."""
    try:
        cap = int(pltpu.get_tpu_info().vmem_capacity_bytes)
    except Exception:
        cap = 64 << 20                       # conservative (v7x-sized) fallback
    if cap >= (100 << 20):                   # v5e / v6e: 128 MiB physical VMEM
        return 96 << 20, 8192
    return 48 << 20, 4096                    # v7x: 64 MiB physical VMEM


def kws_forward(x, prepared, in_cache):
    """x: (B, T, idim) float32. Returns (out: (B, T, odim), out_cache)."""
    w1, b1, w2, b2, w3, b3 = prepared
    B, T, idim = x.shape
    hpad = w1.shape[1]
    odim = w3.shape[1]
    M = B * T
    sub = 8                                  # f32 sublane tile (x / out stay f32)

    vmem_cap, tm_cap = _vmem_budget()

    dsize = jnp.dtype(w1.dtype).itemsize
    # Resident weights/biases; count the (dead) second pipeline copy too.
    weight_bytes = 2 * ((w1.size + w2.size + w3.size) * dsize
                        + (b1.size + b2.size + b3.size) * 4)
    # Per-row VMEM: double-buffered x block + double-buffered compact out block
    # + ~3 live (tm, hpad) f32 activation temporaries.
    per_row = 2 * idim * 4 + 2 * odim * 4 + 3 * hpad * 4

    avail = max(vmem_cap - weight_bytes - (4 << 20), per_row * sub)
    tm_vmem = max((avail // per_row) // sub * sub, sub)

    # Row tile: as big as VMEM / the per-generation cap allow, but keep >=2 grid
    # steps whenever M allows (v7x has 2 TensorCores), and never exceed the rows.
    tm = min(tm_cap, tm_vmem, _round_up(_cdiv(M, 2), sub), _round_up(M, sub))
    tm = max(_round_up(tm, sub), sub)
    grid = (_cdiv(M, tm),)

    # No jnp.pad, no wrapper-side dtype cast: reshape is free.  The ragged final
    # block reads garbage rows past M (never consumed) and its writeback is
    # clipped by Pallas to the (M, odim) output.
    x2d = x.reshape(M, idim)

    def row_map(i):
        return (i, 0)

    def whole_map(i):
        return (0, 0)

    vmem_limit = int(min(vmem_cap,
                         max(weight_bytes + tm * per_row + (8 << 20), 16 << 20)))

    out2d = pl.pallas_call(
        _kws_kernel,
        out_shape=jax.ShapeDtypeStruct((M, odim), jnp.float32),
        grid_spec=pltpu.PrefetchScalarGridSpec(
            num_scalar_prefetch=0,
            grid=grid,
            in_specs=[
                pl.BlockSpec((tm, idim), row_map),      # x rows (streamed)
                pl.BlockSpec((idim, hpad), whole_map),  # fused cmvn+preprocessing weight
                pl.BlockSpec((1, hpad), whole_map),     # fused bias
                pl.BlockSpec((hpad, hpad), whole_map),  # backbone weight
                pl.BlockSpec((1, hpad), whole_map),     # backbone bias
                pl.BlockSpec((hpad, odim), whole_map),  # classifier weight (compact lanes)
                pl.BlockSpec((1, odim), whole_map),     # classifier bias
            ],
            out_specs=pl.BlockSpec((tm, odim), row_map),  # compact (M, odim) output
        ),
        compiler_params=pltpu.CompilerParams(
            dimension_semantics=("parallel",),
            vmem_limit_bytes=vmem_limit),
    )(x2d, w1, b1, w2, b2, w3, b3)

    out = out2d.reshape(B, T, odim)
    # Stateless backbone: cache passes through unchanged.
    out_cache = in_cache
    return out, out_cache


def make_params(key, idim, hdim, odim):
    ks = jax.random.split(key, 8)
    scale = 0.1
    mean = jax.random.normal(ks[0], (1, idim), jnp.float32) * scale
    istd = 1.0 + 0.1 * jax.random.normal(ks[1], (1, idim), jnp.float32)
    w_pre = jax.random.normal(ks[2], (idim, hdim), jnp.float32) * scale
    b_pre = jax.random.normal(ks[3], (1, hdim), jnp.float32) * scale
    w_bb = jax.random.normal(ks[4], (hdim, hdim), jnp.float32) * scale
    b_bb = jax.random.normal(ks[5], (1, hdim), jnp.float32) * scale
    w_cls = jax.random.normal(ks[6], (hdim, odim), jnp.float32) * scale
    b_cls = jax.random.normal(ks[7], (1, odim), jnp.float32) * scale
    return (mean, istd, w_pre, b_pre, w_bb, b_bb, w_cls, b_cls)


if __name__ == "__main__":
    B, T, idim, hdim, odim = 2, 8, 16, 32, 8

    key = jax.random.PRNGKey(0)
    k_x, k_p = jax.random.split(key)
    x = jax.random.normal(k_x, (B, T, idim), jnp.float32)
    raw_params = make_params(k_p, idim, hdim, odim)
    in_cache = jnp.zeros((0, 0, 0), jnp.float32)

    # One-time parameter prep: cmvn fold + hidden-dim lane padding (f32 operands
    # for the demo so the exact-tolerance reference check holds).
    prepared = prepare_params(raw_params)

    out, out_cache = kws_forward(x, prepared, in_cache)
    out = jax.block_until_ready(out)

    # Reference check in plain JAX (original unfused math).
    mean, istd, w_pre, b_pre, w_bb, b_bb, w_cls, b_cls = raw_params
    xr = (x.reshape(B * T, idim) - mean) * istd
    hr = jnp.maximum(xr @ w_pre + b_pre, 0.0)
    hr = jnp.maximum(hr @ w_bb + b_bb, 0.0)
    ref = jax.nn.sigmoid(hr @ w_cls + b_cls).reshape(B, T, odim)

    assert out.shape == (B, T, odim)
    assert out_cache.shape == (0, 0, 0)
    assert jnp.allclose(out, ref, atol=1e-5, rtol=1e-5)

    print("KERNEL_OK")
</pallas_src>

<mosaic_0001>
module attributes {stable_mosaic.version = 11 : i64} {
  func.func @_kws_kernel(%arg0: i32, %arg1: memref<8x16xf32, #tpu.memory_space<vmem>>, %arg2: memref<16x128xf32, #tpu.memory_space<vmem>>, %arg3: memref<1x128xf32, #tpu.memory_space<vmem>>, %arg4: memref<128x128xf32, #tpu.memory_space<vmem>>, %arg5: memref<1x128xf32, #tpu.memory_space<vmem>>, %arg6: memref<128x8xf32, #tpu.memory_space<vmem>>, %arg7: memref<1x8xf32, #tpu.memory_space<vmem>>, %arg8: memref<8x8xf32, #tpu.memory_space<vmem>>) attributes {dimension_semantics = [#tpu.dimension_semantics<parallel>], iteration_bounds = array<i64: 2>, scalar_prefetch = 0 : i64, scratch_operands = 0 : i64, tpu.core_type = #tpu.core_type<tc>, window_params = [{transform_indices = @transform_0, window_bounds = array<i64: 8, 16>}, {pipeline_mode = #tpu.pipeline_mode<synchronous>, transform_indices = @transform_1, window_bounds = array<i64: 16, 128>}, {pipeline_mode = #tpu.pipeline_mode<synchronous>, transform_indices = @transform_2, window_bounds = array<i64: 1, 128>}, {pipeline_mode = #tpu.pipeline_mode<synchronous>, transform_indices = @transform_3, window_bounds = array<i64: 128, 128>}, {pipeline_mode = #tpu.pipeline_mode<synchronous>, transform_indices = @transform_4, window_bounds = array<i64: 1, 128>}, {pipeline_mode = #tpu.pipeline_mode<synchronous>, transform_indices = @transform_5, window_bounds = array<i64: 128, 8>}, {pipeline_mode = #tpu.pipeline_mode<synchronous>, transform_indices = @transform_6, window_bounds = array<i64: 1, 8>}, {transform_indices = @transform_7, window_bounds = array<i64: 8, 8>}]} {
    %c0 = arith.constant 0 : index
    %c0_0 = arith.constant 0 : index
    %0 = vector.load %arg1[%c0, %c0_0] : memref<8x16xf32, #tpu.memory_space<vmem>>, vector<8x16xf32>
    %c0_1 = arith.constant 0 : index
    %c0_2 = arith.constant 0 : index
    %1 = vector.load %arg2[%c0_1, %c0_2] : memref<16x128xf32, #tpu.memory_space<vmem>>, vector<16x128xf32>
    %cst = arith.constant dense<0.000000e+00> : vector<8x128xf32>
    %2 = tpu.matmul %0, %1, %cst {dimension_numbers = #tpu.dot_dimension_numbers<[1], [0], [0], [1], [0, 0, 1, 1], [], []>} : vector<8x16xf32>, vector<16x128xf32>, vector<8x128xf32> -> vector<8x128xf32>
    %c0_3 = arith.constant 0 : index
    %c0_4 = arith.constant 0 : index
    %3 = vector.load %arg3[%c0_3, %c0_4] : memref<1x128xf32, #tpu.memory_space<vmem>>, vector<1x128xf32>
    %4 = vector.broadcast %3 : vector<1x128xf32> to vector<8x128xf32>
    %5 = arith.addf %2, %4 : vector<8x128xf32>
    %cst_5 = arith.constant 0.000000e+00 : f32
    %6 = vector.broadcast %cst_5 : f32 to vector<8x128xf32>
    %7 = arith.maximumf %5, %6 : vector<8x128xf32>
    %c0_6 = arith.constant 0 : index
    %c0_7 = arith.constant 0 : index
    %8 = vector.load %arg4[%c0_6, %c0_7] : memref<128x128xf32, #tpu.memory_space<vmem>>, vector<128x128xf32>
    %cst_8 = arith.constant dense<0.000000e+00> : vector<8x128xf32>
    %9 = tpu.matmul %7, %8, %cst_8 {dimension_numbers = #tpu.dot_dimension_numbers<[1], [0], [0], [1], [0, 0, 1, 1], [], []>} : vector<8x128xf32>, vector<128x128xf32>, vector<8x128xf32> -> vector<8x128xf32>
    %c0_9 = arith.constant 0 : index
    %c0_10 = arith.constant 0 : index
    %10 = vector.load %arg5[%c0_9, %c0_10] : memref<1x128xf32, #tpu.memory_space<vmem>>, vector<1x128xf32>
    %11 = vector.broadcast %10 : vector<1x128xf32> to vector<8x128xf32>
    %12 = arith.addf %9, %11 : vector<8x128xf32>
    %cst_11 = arith.constant 0.000000e+00 : f32
    %13 = vector.broadcast %cst_11 : f32 to vector<8x128xf32>
    %14 = arith.maximumf %12, %13 : vector<8x128xf32>
    %c0_12 = arith.constant 0 : index
    %c0_13 = arith.constant 0 : index
    %15 = vector.load %arg6[%c0_12, %c0_13] : memref<128x8xf32, #tpu.memory_space<vmem>>, vector<128x8xf32>
    %cst_14 = arith.constant dense<0.000000e+00> : vector<8x8xf32>
    %16 = tpu.matmul %14, %15, %cst_14 {dimension_numbers = #tpu.dot_dimension_numbers<[1], [0], [0], [1], [0, 0, 1, 1], [], []>} : vector<8x128xf32>, vector<128x8xf32>, vector<8x8xf32> -> vector<8x8xf32>
    %c0_15 = arith.constant 0 : index
    %c0_16 = arith.constant 0 : index
    %17 = vector.load %arg7[%c0_15, %c0_16] : memref<1x8xf32, #tpu.memory_space<vmem>>, vector<1x8xf32>
    %18 = vector.broadcast %17 : vector<1x8xf32> to vector<8x8xf32>
    %19 = arith.addf %16, %18 : vector<8x8xf32>
    %20 = arith.negf %19 : vector<8x8xf32>
    %21 = math.exp %20 : vector<8x8xf32>
    %cst_17 = arith.constant 1.000000e+00 : f32
    %22 = vector.broadcast %cst_17 : f32 to vector<8x8xf32>
    %23 = arith.addf %22, %21 : vector<8x8xf32>
    %24 = arith.divf %22, %23 : vector<8x8xf32>
    %c0_18 = arith.constant 0 : index
    %c0_19 = arith.constant 0 : index
    %25 = vector.load %arg8[%c0_18, %c0_19] : memref<8x8xf32, #tpu.memory_space<vmem>>, vector<8x8xf32>
    tpu.vector_store %arg8[%c0_18, %c0_19], %24 {strides = array<i32>} : memref<8x8xf32, #tpu.memory_space<vmem>>, vector<8x8xf32>,
    return
  }
  func.func @transform_0(%arg0: i32) -> (i32, i32) {
    %c0_i32 = arith.constant 0 : i32
    %c0_i32_0 = arith.constant 0 : i32
    return %arg0, %c0_i32 : i32, i32
  }
  func.func @transform_1(%arg0: i32) -> (i32, i32) {
    %c0_i32 = arith.constant 0 : i32
    %c0_i32_0 = arith.constant 0 : i32
    %c0_i32_1 = arith.constant 0 : i32
    return %c0_i32, %c0_i32_0 : i32, i32
  }
  func.func @transform_2(%arg0: i32) -> (i32, i32) {
    %c0_i32 = arith.constant 0 : i32
    %c0_i32_0 = arith.constant 0 : i32
    %c0_i32_1 = arith.constant 0 : i32
    return %c0_i32, %c0_i32_0 : i32, i32
  }
  func.func @transform_3(%arg0: i32) -> (i32, i32) {
    %c0_i32 = arith.constant 0 : i32
    %c0_i32_0 = arith.constant 0 : i32
    %c0_i32_1 = arith.constant 0 : i32
    return %c0_i32, %c0_i32_0 : i32, i32
  }
  func.func @transform_4(%arg0: i32) -> (i32, i32) {
    %c0_i32 = arith.constant 0 : i32
    %c0_i32_0 = arith.constant 0 : i32
    %c0_i32_1 = arith.constant 0 : i32
    return %c0_i32, %c0_i32_0 : i32, i32
  }
  func.func @transform_5(%arg0: i32) -> (i32, i32) {
    %c0_i32 = arith.constant 0 : i32
    %c0_i32_0 = arith.constant 0 : i32
    %c0_i32_1 = arith.constant 0 : i32
    return %c0_i32, %c0_i32_0 : i32, i32
  }
  func.func @transform_6(%arg0: i32) -> (i32, i32) {
    %c0_i32 = arith.constant 0 : i32
    %c0_i32_0 = arith.constant 0 : i32
    %c0_i32_1 = arith.constant 0 : i32
    return %c0_i32, %c0_i32_0 : i32, i32
  }
  func.func @transform_7(%arg0: i32) -> (i32, i32) {
    %c0_i32 = arith.constant 0 : i32
    %c0_i32_0 = arith.constant 0 : i32
    return %arg0, %c0_i32 : i32, i32
  }
}

</mosaic_0001>

<bundles_post_ra>
// kernel: tpu_custom_call.1
= control target key start
LH: loop header
LB: loop body
LE: loop exit
PB: predicated region body
PF: predicated region fallthrough
CT: control target
= control target key end

     0   :  { %12 = vsyncpa [#allocation3], 0  ;;  %s929_s24 = smov 0   ;;  %s1117_s0 = inlined_call_operand.vmem [shape: f32[16,16], index: 0, kind: input, shape index: {}]   ;;  %s1118_s1 = inlined_call_operand.hbm [shape: f32[16,128], index: 1, kind: input, shape index: {}]   ;;  %s1119_s2 = inlined_call_operand.vmem [shape: f32[1,128], index: 2, kind: input, shape index: {}]   ;;  %s1120_s3 = inlined_call_operand.vmem [shape: f32[128,128], index: 3, kind: input, shape index: {}]   ;;  %s1121_s4 = inlined_call_operand.vmem [shape: f32[1,128], index: 4, kind: input, shape index: {}]   ;;  %s1122_s5 = inlined_call_operand.vmem [shape: f32[128,8], index: 5, kind: input, shape index: {}]   ;;  %s1123_s6 = inlined_call_operand.vmem [shape: f32[1,8], index: 6, kind: input, shape index: {}]   ;;  %s1124_s7 = inlined_call_operand.vmem [shape: f32[16,8], index: 7, kind: output, shape index: {}]  }
   0x1 LB: > { %s935_s25 = sadd.s32 4294967295, %s881_s24   ;;  %p636_p0 = scmp.ge.s32.totalorder %s881_s24, 1  ;;  %s881_s24 = sphi %s929_s24, %s18_s24  }
   0x2   : > { %p201_p1 = scmp.lt.s32.totalorder %s881_s24, 3  ;;  %s883_s26 = smov [#allocation2]  }
   0x3   : > { %s213_s27 = sshll.u32 %s883_s26, 4  ;;  %p1125_p3 = scmp.eq.s32.totalorder %s935_s25, 0  ;;  %s214_s27 = int_to_ptr.vmem [resolvable:$true] %s213_s27 }
   0x4   : > { %p939_p2 = pnand %p636_p0, %p201_p1  ;;  %s843_s9 = scalar_lea.hbm %s1118_s1, 256 }
   0x5   : > { %p844_p6 = scmp.ne.s32.totalorder %s1118_s1, %s843_s9  ;;  %p850_p10 = scmp.lt.u32.totalorder %s843_s9, %s1118_s1 }
   0x6   : > { %s1127_s28 = scalar_select %p939_p2, 1, 0 }
   0x7   : > { %p819_p4 = pneg %p939_p2 }
   0x9   : > { %p948_p5 = pnand %p1125_p3, %p819_p4 }
   0xb   : > { %p845_p7 = pneg %p948_p5 }
   0xd   : > { %p846_p8 = pnand %p845_p7, %p844_p6 }
   0xf   : > { %p847_p9 = pneg %p846_p8 }
  0x11   : > { %p852_p11 = pnand %p850_p10, %p847_p9 }
  0x13   : > { %855 = shalt.err (!%p852_p11)
}
  0x14   : > { %s856_s14 = scalar_lea.vmem %s214_s27, 256  ;;  %p864_p1 = scmp.lt.s32.totalorder %s214_s27, %s214_s27 }
  0x15   : > { %p857_p12 = scmp.ne.s32.totalorder %s214_s27, %s856_s14  ;;  %p865_p4 = scmp.lt.s32.totalorder %s856_s14, %s856_s14 }
  0x17   : > { %p859_p13 = pnand %p857_p12, %p845_p7  ;;  %p866_p3 = por %p865_p4, %p864_p1 }
  0x19   : > { %p860_p0 = pneg %p859_p13 }
  0x1b   : > { %p867_p2 = pnand %p866_p3, %p860_p0 }
  0x1d   : > { %870 = shalt.err (!%p867_p2)
}
  0x1e   : > { %s884_s15 = smov 128   ;;  %s885_s16 = smov 8  }
  0x1f   : > { %822 = dma.hbm_to_vmem [thread:$0]  (!%p948_p5), %s1118_s1, 256, %s214_s27, [#allocation3], %s884_s15, %s884_s15, %s885_s16  }
  0x20   : > { %p1129_p6 = scmp.ne.s32.totalorder %s1127_s28, 0 }
  0x21   : > { %p1130_p8 = scmp.eq.s32.totalorder (!%p1129_p6), %s935_s25, 0 }
  0x22   : > { %251 = sbr.rel (%p1129_p6) target bundleno = 721 (0x2d1), region = 48 }
  0x29   : > { %876 = dma.done.wait (%p1130_p8), [#allocation3], 256   ;;  %p1131_p7 = pmov %p1130_p8 }
  0x2a   : > { %p281_p2 = scmp.lt.s32.totalorder %s935_s25, 1  ;;  %v886_v0 = vmov 0.0|0.0   ;;  %vm887_vm0 = vmmov 0   ;;  %v888_v1 = vmov 0.0   ;;  %v290_v2 = vld [vmem:[#allocation2] sm:$0xff]  ;;  %v291_v3 = vld [vmem:[#allocation2 + $0x8] sm:$0xff] }
  0x2b   : > { %878 = vsyncadd (%p1131_p7), [#allocation3], 4294967040  ;;  %764 = vmatprep.subr.bf16.mxu0 %v886_v0  ;;  %691 = vmatprep.mubr.msk.f32.mxu0 %vm887_vm0, %v888_v1  ;;  %v765_v4 = vpack.c.bf16 %v291_v3, %v290_v2  ;;  %v374_v5 = vld [vmem:[%s1120_s3] sm:$0xff]  ;;  %v375_v6 = vld [vmem:[%s1120_s3 + $0x8] sm:$0xff]  ;;  %vm299_vm1 = vcmask 130048   ;;  %vm567_vm2 = vcmask 64512  }
  0x2c   : > { %s1133_s25 = smov (!%p281_p2, %s935_s25), 1  ;;  %767 = vmatprep.subr.bf16.mxu1 %v886_v0  ;;  %726 = vmatprep.mubr.msk.f32.mxu1 %vm887_vm0, %v888_v1  ;;  %v376_v7 = vld [vmem:[%s1120_s3 + $0x10] sm:$0xff]  ;;  %v768_v8 = vpack.c.bf16 %v375_v6, %v374_v5  ;;  %v377_v9 = vld [vmem:[%s1120_s3 + $0x18] sm:$0xff]  ;;  %v378_v12 = vld [vmem:[%s1120_s3 + $0x20] sm:$0xff] }
  0x2d   : > { %s641_s19 = sshll.u32 %s1133_s25, 3  ;;  %766 = vmatpush3.bf16.msra.mxu0 %v765_v4  ;;  %v771_v11 = vpack.c.bf16 %v377_v9, %v376_v7  ;;  %v379_v13 = vld [vmem:[%s1120_s3 + $0x28] sm:$0xff]  ;;  %v380_v15 = vld [vmem:[%s1120_s3 + $0x30] sm:$0xff]  ;;  %v381_v16 = vld [vmem:[%s1120_s3 + $0x38] sm:$0xff] }
  0x2e   : > { %s284_s22 = scalar_lea.vmem %s1117_s0, %s641_s19  ;;  %769 = vmatpush3.bf16.msra.mxu1 %v768_v8  ;;  %791 = vmatprep.subr.bf16.mxu0 %v886_v0  ;;  %v774_v14 = vpack.c.bf16 %v379_v13, %v378_v12  ;;  %v777_v17 = vpack.c.bf16 %v381_v16, %v380_v15  ;;  %v382_v18 = vld [vmem:[%s1120_s3 + $0x40] sm:$0xff]  ;;  %v383_v19 = vld [vmem:[%s1120_s3 + $0x48] sm:$0xff]  ;;  %v384_v21 = vld [vmem:[%s1120_s3 + $0x50] sm:$0xff]  ;;  %s288_s14 = scalar_lea.vmem %s1124_s7, %s641_s19 }
  0x2f   : > { %v289_v10 = vld [vmem:[%s284_s22] sm:$0xff]  ;;  %770 = vmatprep.subr.bf16.mxu1 %v886_v0  ;;  %v780_v20 = vpack.c.bf16 %v383_v19, %v382_v18  ;;  %v385_v22 = vld [vmem:[%s1120_s3 + $0x58] sm:$0xff]  ;;  %v387_v25 = vld [vmem:[%s1120_s3 + $0x68] sm:$0xff] }
  0x30   : > { %692 = vmatmul.mubr.msk.f32.vlgmr.msra.gmra.mrb[0].mxu0 %vm299_vm1, %v289_v10  ;;  %v783_v23 = vpack.c.bf16 %v385_v22, %v384_v21  ;;  %v386_v24 = vld [vmem:[%s1120_s3 + $0x60] sm:$0xff]  ;;  %v388_v27 = vld [vmem:[%s1120_s3 + $0x70] sm:$0xff]  ;;  %v389_v28 = vld [vmem:[%s1120_s3 + $0x78] sm:$0xff] }
  0x31   : > { %761 = vmatprep.mubr.msk.f32.mxu0 %vm887_vm0, %v888_v1  ;;  %v786_v26 = vpack.c.bf16 %v387_v25, %v386_v24  ;;  %v789_v29 = vpack.c.bf16 %v389_v28, %v388_v27  ;;  %v468_v30 = vld [vmem:[%s1122_s5] sm:$0xff]  ;;  %v469_v31 = vld [vmem:[%s1122_s5 + $0x8] sm:$0xff]  ;;  %v470_v32 = vld [vmem:[%s1122_s5 + $0x10] sm:$0xff] }
  0x32   : > { %772 = vmatpush3.bf16.msra.mxu1 %v771_v11  ;;  %v792_v33 = vpack.c.bf16 %v469_v31, %v468_v30  ;;  %v471_v34 = vld [vmem:[%s1122_s5 + $0x18] sm:$0xff]  ;;  %v472_v36 = vld [vmem:[%s1122_s5 + $0x20] sm:$0xff]  ;;  %v473_v37 = vld [vmem:[%s1122_s5 + $0x28] sm:$0xff] }
  0x33   : > { %773 = vmatprep.subr.bf16.mxu1 %v886_v0  ;;  %v795_v35 = vpack.c.bf16 %v471_v34, %v470_v32  ;;  %v798_v38 = vpack.c.bf16 %v473_v37, %v472_v36  ;;  %v474_v39 = vld [vmem:[%s1122_s5 + $0x30] sm:$0xff]  ;;  %v475_v40 = vld [vmem:[%s1122_s5 + $0x38] sm:$0xff]  ;;  %v476_v42 = vld [vmem:[%s1122_s5 + $0x40] sm:$0xff] }
  0x34   : > { %793 = vmatpush3.bf16.msra.mxu0 %v792_v33  ;;  %v801_v41 = vpack.c.bf16 %v475_v40, %v474_v39  ;;  %v477_v43 = vld [vmem:[%s1122_s5 + $0x48] sm:$0xff]  ;;  %v478_v45 = vld [vmem:[%s1122_s5 + $0x50] sm:$0xff]  ;;  %v479_v46 = vld [vmem:[%s1122_s5 + $0x58] sm:$0xff] }
  0x35   : > { %794 = vmatprep.subr.bf16.mxu0 %v886_v0  ;;  %v804_v44 = vpack.c.bf16 %v477_v43, %v476_v42  ;;  %v807_v47 = vpack.c.bf16 %v479_v46, %v478_v45  ;;  %v480_v48 = vld [vmem:[%s1122_s5 + $0x60] sm:$0xff]  ;;  %v481_v49 = vld [vmem:[%s1122_s5 + $0x68] sm:$0xff]  ;;  %v482_v56 = vld [vmem:[%s1122_s5 + $0x70] sm:$0xff] }
  0x36   : > { %775 = vmatpush3.bf16.msra.mxu1 %v774_v14  ;;  %v810_v50 = vpack.c.bf16 %v481_v49, %v480_v48  ;;  %v643_v51 = vld [vmem:[%s1119_s2] ss:$0 sm:$0xff]  ;;  %v483_v57 = vld [vmem:[%s1122_s5 + $0x78] sm:$0xff] }
  0x37   : > { %776 = vmatprep.subr.bf16.mxu1 %v886_v0  ;;  %v813_v58 = vpack.c.bf16 %v483_v57, %v482_v56  ;;  %v645_v59 = vld [vmem:[%s1121_s4] ss:$0 sm:$0xff] }
  0x38   : > { %796 = vmatpush3.bf16.msra.mxu0 %v795_v35 }
  0x39   : > { %797 = vmatprep.subr.bf16.mxu0 %v886_v0 }
  0x3a   : > { %778 = vmatpush3.bf16.msra.mxu1 %v777_v17 }
  0x3b   : > { %779 = vmatprep.subr.bf16.mxu1 %v886_v0 }
  0x3c   : > { %799 = vmatpush3.bf16.msra.mxu0 %v798_v38 }
  0x3d   : > { %800 = vmatprep.subr.bf16.mxu0 %v886_v0 }
  0x3e   : > { %781 = vmatpush3.bf16.msra.mxu1 %v780_v20 }
  0x3f   : > { %782 = vmatprep.subr.bf16.mxu1 %v886_v0 }
  0x40   : > { %802 = vmatpush3.bf16.msra.mxu0 %v801_v41 }
  0x41   : > { %803 = vmatprep.subr.bf16.mxu0 %v886_v0 }
  0x42   : > { %784 = vmatpush3.bf16.msra.mxu1 %v783_v23 }
  0x43   : > { %785 = vmatprep.subr.bf16.mxu1 %v886_v0 }
  0x44   : > { %805 = vmatpush3.bf16.msra.mxu0 %v804_v44 }
  0x45   : > { %806 = vmatprep.subr.bf16.mxu0 %v886_v0 }
  0x46   : > { %787 = vmatpush3.bf16.msra.mxu1 %v786_v26 }
  0x47   : > { %788 = vmatprep.subr.bf16.mxu1 %v886_v0 }
  0x48   : > { %808 = vmatpush3.bf16.msra.mxu0 %v807_v47 }
  0x49   : > { %809 = vmatprep.subr.bf16.mxu0 %v886_v0 }
  0x4a   : > { %790 = vmatpush3.bf16.msra.mxu1 %v789_v29 }
  0x4c   : > { %811 = vmatpush3.bf16.msra.mxu0 %v810_v50 }
  0x4d   : > { %812 = vmatprep.subr.bf16.mxu0 %v886_v0  ;;  %v646_v0 = vld [vmem:[%s1123_s6] ss:$0 sm:$0xff] }
  0x50   : > { %814 = vmatpush3.bf16.msra.mxu0 %v813_v58 }
 0x103   : > { %v369_v52 = vpop.f32.mrb[0].mxu0 }
 0x104   : > { %v370_v53 = vadd.f32 %v643_v51, %v369_v52  ;;  %v693_v54 = vpop.f32.mrb[1].mxu0 }
 0x106   : > { %v373_v55 = vmax.f32 %v370_v53, 0.0 }
 0x108   : > { %727 = vmatmul.mubr.f32.vlgmr.msra.gmra.mrb[0].mxu1 %v373_v55 }
 0x1db   : > { %v463_v60 = vpop.f32.mrb[0].mxu1 }
 0x1dc   : > { %v464_v61 = vadd.f32 %v645_v59, %v463_v60  ;;  %v728_v62 = vpop.f32.mrb[1].mxu1 }
 0x1de   : > { %v467_v63 = vmax.f32 %v464_v61, 0.0 }
 0x1e0   : > { %762 = vmatmul.mubr.f32.vlgmr.msra.gmra.mrb[2].mxu0 %v467_v63 }
 0x2b3   : > { %v557_v1 = vpop.f32.mrb[2].mxu0 }
 0x2b4   : > { %v558_v2 = vadd.f32 %v646_v0, %v557_v1  ;;  %v763_v3 = vpop.f32.mrb[3].mxu0 }
 0x2b6   : > { %v647_v4 = vmul.f32 -1.442695, %v558_v2 }
 0x2b8   : > { %839 = vpow2.f32 %v647_v4 }
 0x2c2   : > { %v840_v5 = vpop.eup %839 }
 0x2c3   : > { %v564_v6 = vadd.f32 1.0, %v840_v5 }
 0x2c5   : > { %841 = vrcp.f32 %v564_v6 }
 0x2cf   : > { %v842_v7 = vpop.eup %841 }
 0x2d0   : > { %568 = vst.msk [vmem:[%s288_s14] sm:$0xff] %vm567_vm2, %v842_v7 }
 0x2d1 PF: > { %s18_s24 = sadd.s32 1, %s881_s24  }
 0x2d2   : > { %p15_p3 = scmp.ge.s32.totalorder %s18_s24, 4  }
 0x2d4   :  { %17 = sbr.rel (!%p15_p3) target bundleno = 1 (0x1), region = 83 }
 0x2db   :  { %588 = vsyncpa [#allocation3], 1 }
 0x2dc   :  { %590 = vsyncpa [#allocation3 + $0x1], 1 }

</bundles_post_ra>
